<compile_context>
chip_gen: v7x
topology: tpu7x:2x2x1
jax: 0.10.0
libtpu: 0.0.40
codegen_flags: <defaults>
</compile_context>

<pallas_src>
import jax
import jax.numpy as jnp
import numpy as np
from jax.experimental import pallas as pl
from jax.experimental.pallas import tpu as pltpu


def _sage2_kernel(adj_ref, inv_ref, x_ref,
                  w1s_ref, w1n_ref, b1_ref,
                  w2s_ref, w2n_ref, b2_ref,
                  o_ref, h_ref):
    """Fused 2-layer GraphSAGE forward. Everything resident in VMEM."""
    adj = adj_ref[...]                       # (N, N)  bf16, exact 0/1
    inv = inv_ref[...]                       # (N, 1)  f32, 1/in_degree

    # ---------------- layer 1 (mean agg + self/neigh linear + ReLU) ----------
    # Aggregation: bf16 MXU matmul with f32 accumulation, then f32 mean scale.
    neigh1 = jnp.dot(adj, x_ref[...], preferred_element_type=jnp.float32) * inv
    # Two dots accumulated in f32 (no lane-axis concat).
    h = jnp.dot(x_ref[...], w1s_ref[...], preferred_element_type=jnp.float32)
    h = h + jnp.dot(neigh1.astype(jnp.bfloat16), w1n_ref[...],
                    preferred_element_type=jnp.float32)
    h = jnp.maximum(h + b1_ref[...], 0.0)    # bias + ReLU in f32
    h_ref[...] = h.astype(jnp.bfloat16)      # layer-1 activation stays in VMEM

    # ---------------- layer 2 (mean agg + self/neigh linear, no activation) --
    h_bf = h_ref[...]                        # (N, Dh_pad) bf16
    neigh2 = jnp.dot(adj, h_bf, preferred_element_type=jnp.float32) * inv
    out = jnp.dot(h_bf, w2s_ref[...], preferred_element_type=jnp.float32)
    out = out + jnp.dot(neigh2.astype(jnp.bfloat16), w2n_ref[...],
                        preferred_element_type=jnp.float32)
    o_ref[...] = (out + b2_ref[...]).astype(o_ref.dtype)


def _round_up(v, m):
    return ((v + m - 1) // m) * m


def _pad2(a, rows, cols, dtype):
    r, c = a.shape
    return jnp.pad(a, ((0, rows - r), (0, cols - c))).astype(dtype)


def graphsage_forward(adj, inv_deg, x, params, *, lane=128):
    """Two-layer GraphSAGE forward (layer1: relu, layer2: linear) as one kernel."""
    N, d_in = x.shape
    n_hidden = params["l1_w_self"].shape[1]
    n_classes = params["l2_w_self"].shape[1]

    # Lane-pad every feature dimension to a multiple of 128 (lane-dense ops).
    d_in_p = _round_up(d_in, lane)
    d_h_p = _round_up(n_hidden, lane)
    d_o_p = _round_up(n_classes, lane)

    adj_b = adj.astype(jnp.bfloat16)                       # exact 0/1 in bf16
    inv_f = inv_deg.astype(jnp.float32)                    # (N, 1) f32
    x_p = _pad2(x, N, d_in_p, jnp.bfloat16)

    w1s = _pad2(params["l1_w_self"], d_in_p, d_h_p, jnp.bfloat16)
    w1n = _pad2(params["l1_w_neigh"], d_in_p, d_h_p, jnp.bfloat16)
    b1 = _pad2(params["l1_b"], 1, d_h_p, jnp.float32)
    w2s = _pad2(params["l2_w_self"], d_h_p, d_o_p, jnp.bfloat16)
    w2n = _pad2(params["l2_w_neigh"], d_h_p, d_o_p, jnp.bfloat16)
    b2 = _pad2(params["l2_b"], 1, d_o_p, jnp.float32)

    full = lambda shape: pl.BlockSpec(shape, lambda i: tuple(0 for _ in shape))

    out = pl.pallas_call(
        _sage2_kernel,
        out_shape=jax.ShapeDtypeStruct((N, d_o_p), jnp.float32),
        grid_spec=pltpu.PrefetchScalarGridSpec(
            num_scalar_prefetch=0,
            grid=(1,),                                     # single tile: N=128 fits VMEM
            in_specs=[
                full((N, N)),                              # adjacency (exact 0/1 bf16)
                full((N, 1)),                              # 1/in_degree (f32)
                full((N, d_in_p)),                         # padded features
                full((d_in_p, d_h_p)),                     # W1_self
                full((d_in_p, d_h_p)),                     # W1_neigh
                full((1, d_h_p)),                          # b1
                full((d_h_p, d_o_p)),                      # W2_self
                full((d_h_p, d_o_p)),                      # W2_neigh
                full((1, d_o_p)),                          # b2
            ],
            out_specs=full((N, d_o_p)),
            scratch_shapes=[pltpu.VMEM((N, d_h_p), jnp.bfloat16)],  # layer-1 activation
        ),
        compiler_params=pltpu.CompilerParams(
            dimension_semantics=("arbitrary",),
            vmem_limit_bytes=32 * 1024 * 1024),
    )(adj_b, inv_f, x_p, w1s, w1n, b1, w2s, w2n, b2)

    return out[:, :n_classes]


def reference_forward(adj, inv_deg, x, params):
    """Pure f32 jnp reference matching the PyTorch/DGL module semantics."""
    def layer(h, ws, wn, b, relu):
        neigh = (adj @ h) * inv_deg
        out = h @ ws + neigh @ wn + b
        return jnp.maximum(out, 0.0) if relu else out
    h = layer(x, params["l1_w_self"], params["l1_w_neigh"], params["l1_b"], True)
    return layer(h, params["l2_w_self"], params["l2_w_neigh"], params["l2_b"], False)


def xavier_uniform(key, shape, gain):
    fan_in, fan_out = shape  # pre-transposed layout: y = x @ W
    bound = gain * np.sqrt(6.0 / (fan_in + fan_out))
    return jax.random.uniform(key, shape, jnp.float32, -bound, bound)


if __name__ == "__main__":
    N = 128            # number of nodes
    in_feats = 64
    n_hidden = 32
    n_classes = 16

    key = jax.random.PRNGKey(0)
    k_adj, k_x, k1, k2, k3, k4, k5, k6 = jax.random.split(key, 8)

    # synthetic graph: dense adjacency, adj[dst, src] = 1.0 for edge src->dst
    adj = jax.random.bernoulli(k_adj, p=0.1, shape=(N, N)).astype(jnp.float32)
    deg = jnp.sum(adj, axis=1, keepdims=True)                  # in-degree
    inv_deg = 1.0 / jnp.maximum(deg, 1.0)                      # mean agg (0-deg -> 0)

    x = jax.random.normal(k_x, (N, in_feats), jnp.float32)

    gain = float(np.sqrt(2.0))  # calculate_gain('relu')
    params = {
        "l1_w_self":  xavier_uniform(k1, (in_feats, n_hidden), gain),
        "l1_w_neigh": xavier_uniform(k2, (in_feats, n_hidden), gain),
        "l1_b":       jax.random.uniform(k3, (1, n_hidden), jnp.float32,
                                         -1.0 / np.sqrt(in_feats), 1.0 / np.sqrt(in_feats)),
        "l2_w_self":  xavier_uniform(k4, (n_hidden, n_classes), gain),
        "l2_w_neigh": xavier_uniform(k5, (n_hidden, n_classes), gain),
        "l2_b":       jax.random.uniform(k6, (1, n_classes), jnp.float32,
                                         -1.0 / np.sqrt(n_hidden), 1.0 / np.sqrt(n_hidden)),
    }

    out = graphsage_forward(adj, inv_deg, x, params)
    out = jax.block_until_ready(out)

    ref = reference_forward(adj, inv_deg, x, params)
    # bf16 features/weights with f32 accumulation -> relaxed tolerance vs f32 ref.
    np.testing.assert_allclose(np.asarray(out), np.asarray(ref), rtol=5e-2, atol=5e-2)

    print("KERNEL_OK")
</pallas_src>

<mosaic_0001>
module attributes {stable_mosaic.version = 11 : i64} {
  func.func @_sage2_kernel(%arg0: i32, %arg1: memref<128x128xbf16, #tpu.memory_space<vmem>>, %arg2: memref<128x1xf32, #tpu.memory_space<vmem>>, %arg3: memref<128x128xbf16, #tpu.memory_space<vmem>>, %arg4: memref<128x128xbf16, #tpu.memory_space<vmem>>, %arg5: memref<128x128xbf16, #tpu.memory_space<vmem>>, %arg6: memref<1x128xf32, #tpu.memory_space<vmem>>, %arg7: memref<128x128xbf16, #tpu.memory_space<vmem>>, %arg8: memref<128x128xbf16, #tpu.memory_space<vmem>>, %arg9: memref<1x128xf32, #tpu.memory_space<vmem>>, %arg10: memref<128x128xf32, #tpu.memory_space<vmem>>, %arg11: memref<128x128xbf16, #tpu.memory_space<vmem>>) attributes {dimension_semantics = [#tpu.dimension_semantics<arbitrary>], iteration_bounds = array<i64: 1>, scalar_prefetch = 0 : i64, scratch_operands = 1 : i64, tpu.core_type = #tpu.core_type<tc>, window_params = [{pipeline_mode = #tpu.pipeline_mode<synchronous>, transform_indices = @transform_0, window_bounds = array<i64: 128, 128>}, {pipeline_mode = #tpu.pipeline_mode<synchronous>, transform_indices = @transform_1, window_bounds = array<i64: 128, 1>}, {pipeline_mode = #tpu.pipeline_mode<synchronous>, transform_indices = @transform_2, window_bounds = array<i64: 128, 128>}, {pipeline_mode = #tpu.pipeline_mode<synchronous>, transform_indices = @transform_3, window_bounds = array<i64: 128, 128>}, {pipeline_mode = #tpu.pipeline_mode<synchronous>, transform_indices = @transform_4, window_bounds = array<i64: 128, 128>}, {pipeline_mode = #tpu.pipeline_mode<synchronous>, transform_indices = @transform_5, window_bounds = array<i64: 1, 128>}, {pipeline_mode = #tpu.pipeline_mode<synchronous>, transform_indices = @transform_6, window_bounds = array<i64: 128, 128>}, {pipeline_mode = #tpu.pipeline_mode<synchronous>, transform_indices = @transform_7, window_bounds = array<i64: 128, 128>}, {pipeline_mode = #tpu.pipeline_mode<synchronous>, transform_indices = @transform_8, window_bounds = array<i64: 1, 128>}, {pipeline_mode = #tpu.pipeline_mode<synchronous>, transform_indices = @transform_9, window_bounds = array<i64: 128, 128>}]} {
    %c0 = arith.constant 0 : index
    %c0_0 = arith.constant 0 : index
    %0 = vector.load %arg1[%c0, %c0_0] : memref<128x128xbf16, #tpu.memory_space<vmem>>, vector<128x128xbf16>
    %c0_1 = arith.constant 0 : index
    %c0_2 = arith.constant 0 : index
    %1 = vector.load %arg2[%c0_1, %c0_2] : memref<128x1xf32, #tpu.memory_space<vmem>>, vector<128x1xf32>
    %c0_3 = arith.constant 0 : index
    %c0_4 = arith.constant 0 : index
    %2 = vector.load %arg3[%c0_3, %c0_4] : memref<128x128xbf16, #tpu.memory_space<vmem>>, vector<128x128xbf16>
    %cst = arith.constant dense<0.000000e+00> : vector<128x128xf32>
    %3 = tpu.matmul %0, %2, %cst {dimension_numbers = #tpu.dot_dimension_numbers<[1], [0], [0], [1], [0, 0, 1, 1], [], []>} : vector<128x128xbf16>, vector<128x128xbf16>, vector<128x128xf32> -> vector<128x128xf32>
    %4 = vector.broadcast %1 : vector<128x1xf32> to vector<128x128xf32>
    %5 = arith.mulf %3, %4 : vector<128x128xf32>
    %c0_5 = arith.constant 0 : index
    %c0_6 = arith.constant 0 : index
    %6 = vector.load %arg3[%c0_5, %c0_6] : memref<128x128xbf16, #tpu.memory_space<vmem>>, vector<128x128xbf16>
    %c0_7 = arith.constant 0 : index
    %c0_8 = arith.constant 0 : index
    %7 = vector.load %arg4[%c0_7, %c0_8] : memref<128x128xbf16, #tpu.memory_space<vmem>>, vector<128x128xbf16>
    %cst_9 = arith.constant dense<0.000000e+00> : vector<128x128xf32>
    %8 = tpu.matmul %6, %7, %cst_9 {dimension_numbers = #tpu.dot_dimension_numbers<[1], [0], [0], [1], [0, 0, 1, 1], [], []>} : vector<128x128xbf16>, vector<128x128xbf16>, vector<128x128xf32> -> vector<128x128xf32>
    %9 = arith.truncf %5 : vector<128x128xf32> to vector<128x128xbf16>
    %c0_10 = arith.constant 0 : index
    %c0_11 = arith.constant 0 : index
    %10 = vector.load %arg5[%c0_10, %c0_11] : memref<128x128xbf16, #tpu.memory_space<vmem>>, vector<128x128xbf16>
    %cst_12 = arith.constant dense<0.000000e+00> : vector<128x128xf32>
    %11 = tpu.matmul %9, %10, %cst_12 {dimension_numbers = #tpu.dot_dimension_numbers<[1], [0], [0], [1], [0, 0, 1, 1], [], []>} : vector<128x128xbf16>, vector<128x128xbf16>, vector<128x128xf32> -> vector<128x128xf32>
    %12 = arith.addf %8, %11 : vector<128x128xf32>
    %c0_13 = arith.constant 0 : index
    %c0_14 = arith.constant 0 : index
    %13 = vector.load %arg6[%c0_13, %c0_14] : memref<1x128xf32, #tpu.memory_space<vmem>>, vector<1x128xf32>
    %14 = vector.broadcast %13 : vector<1x128xf32> to vector<128x128xf32>
    %15 = arith.addf %12, %14 : vector<128x128xf32>
    %cst_15 = arith.constant 0.000000e+00 : f32
    %16 = vector.broadcast %cst_15 : f32 to vector<128x128xf32>
    %17 = arith.maximumf %15, %16 : vector<128x128xf32>
    %18 = arith.truncf %17 : vector<128x128xf32> to vector<128x128xbf16>
    %c0_16 = arith.constant 0 : index
    %c0_17 = arith.constant 0 : index
    %19 = vector.load %arg11[%c0_16, %c0_17] : memref<128x128xbf16, #tpu.memory_space<vmem>>, vector<128x128xbf16>
    tpu.vector_store %arg11[%c0_16, %c0_17], %18 {strides = array<i32>} : memref<128x128xbf16, #tpu.memory_space<vmem>>, vector<128x128xbf16>,
    %c0_18 = arith.constant 0 : index
    %c0_19 = arith.constant 0 : index
    %20 = vector.load %arg11[%c0_18, %c0_19] : memref<128x128xbf16, #tpu.memory_space<vmem>>, vector<128x128xbf16>
    %cst_20 = arith.constant dense<0.000000e+00> : vector<128x128xf32>
    %21 = tpu.matmul %0, %20, %cst_20 {dimension_numbers = #tpu.dot_dimension_numbers<[1], [0], [0], [1], [0, 0, 1, 1], [], []>} : vector<128x128xbf16>, vector<128x128xbf16>, vector<128x128xf32> -> vector<128x128xf32>
    %22 = vector.broadcast %1 : vector<128x1xf32> to vector<128x128xf32>
    %23 = arith.mulf %21, %22 : vector<128x128xf32>
    %c0_21 = arith.constant 0 : index
    %c0_22 = arith.constant 0 : index
    %24 = vector.load %arg7[%c0_21, %c0_22] : memref<128x128xbf16, #tpu.memory_space<vmem>>, vector<128x128xbf16>
    %cst_23 = arith.constant dense<0.000000e+00> : vector<128x128xf32>
    %25 = tpu.matmul %20, %24, %cst_23 {dimension_numbers = #tpu.dot_dimension_numbers<[1], [0], [0], [1], [0, 0, 1, 1], [], []>} : vector<128x128xbf16>, vector<128x128xbf16>, vector<128x128xf32> -> vector<128x128xf32>
    %26 = arith.truncf %23 : vector<128x128xf32> to vector<128x128xbf16>
    %c0_24 = arith.constant 0 : index
    %c0_25 = arith.constant 0 : index
    %27 = vector.load %arg8[%c0_24, %c0_25] : memref<128x128xbf16, #tpu.memory_space<vmem>>, vector<128x128xbf16>
    %cst_26 = arith.constant dense<0.000000e+00> : vector<128x128xf32>
    %28 = tpu.matmul %26, %27, %cst_26 {dimension_numbers = #tpu.dot_dimension_numbers<[1], [0], [0], [1], [0, 0, 1, 1], [], []>} : vector<128x128xbf16>, vector<128x128xbf16>, vector<128x128xf32> -> vector<128x128xf32>
    %29 = arith.addf %25, %28 : vector<128x128xf32>
    %c0_27 = arith.constant 0 : index
    %c0_28 = arith.constant 0 : index
    %30 = vector.load %arg9[%c0_27, %c0_28] : memref<1x128xf32, #tpu.memory_space<vmem>>, vector<1x128xf32>
    %31 = vector.broadcast %30 : vector<1x128xf32> to vector<128x128xf32>
    %32 = arith.addf %29, %31 : vector<128x128xf32>
    %c0_29 = arith.constant 0 : index
    %c0_30 = arith.constant 0 : index
    %33 = vector.load %arg10[%c0_29, %c0_30] : memref<128x128xf32, #tpu.memory_space<vmem>>, vector<128x128xf32>
    tpu.vector_store %arg10[%c0_29, %c0_30], %32 {strides = array<i32>} : memref<128x128xf32, #tpu.memory_space<vmem>>, vector<128x128xf32>,
    return
  }
  func.func @transform_0(%arg0: i32) -> (i32, i32) {
    %c0_i32 = arith.constant 0 : i32
    %c0_i32_0 = arith.constant 0 : i32
    %c0_i32_1 = arith.constant 0 : i32
    return %c0_i32, %c0_i32_0 : i32, i32
  }
  func.func @transform_1(%arg0: i32) -> (i32, i32) {
    %c0_i32 = arith.constant 0 : i32
    %c0_i32_0 = arith.constant 0 : i32
    %c0_i32_1 = arith.constant 0 : i32
    return %c0_i32, %c0_i32_0 : i32, i32
  }
  func.func @transform_2(%arg0: i32) -> (i32, i32) {
    %c0_i32 = arith.constant 0 : i32
    %c0_i32_0 = arith.constant 0 : i32
    %c0_i32_1 = arith.constant 0 : i32
    return %c0_i32, %c0_i32_0 : i32, i32
  }
  func.func @transform_3(%arg0: i32) -> (i32, i32) {
    %c0_i32 = arith.constant 0 : i32
    %c0_i32_0 = arith.constant 0 : i32
    %c0_i32_1 = arith.constant 0 : i32
    return %c0_i32, %c0_i32_0 : i32, i32
  }
  func.func @transform_4(%arg0: i32) -> (i32, i32) {
    %c0_i32 = arith.constant 0 : i32
    %c0_i32_0 = arith.constant 0 : i32
    %c0_i32_1 = arith.constant 0 : i32
    return %c0_i32, %c0_i32_0 : i32, i32
  }
  func.func @transform_5(%arg0: i32) -> (i32, i32) {
    %c0_i32 = arith.constant 0 : i32
    %c0_i32_0 = arith.constant 0 : i32
    %c0_i32_1 = arith.constant 0 : i32
    return %c0_i32, %c0_i32_0 : i32, i32
  }
  func.func @transform_6(%arg0: i32) -> (i32, i32) {
    %c0_i32 = arith.constant 0 : i32
    %c0_i32_0 = arith.constant 0 : i32
    %c0_i32_1 = arith.constant 0 : i32
    return %c0_i32, %c0_i32_0 : i32, i32
  }
  func.func @transform_7(%arg0: i32) -> (i32, i32) {
    %c0_i32 = arith.constant 0 : i32
    %c0_i32_0 = arith.constant 0 : i32
    %c0_i32_1 = arith.constant 0 : i32
    return %c0_i32, %c0_i32_0 : i32, i32
  }
  func.func @transform_8(%arg0: i32) -> (i32, i32) {
    %c0_i32 = arith.constant 0 : i32
    %c0_i32_0 = arith.constant 0 : i32
    %c0_i32_1 = arith.constant 0 : i32
    return %c0_i32, %c0_i32_0 : i32, i32
  }
  func.func @transform_9(%arg0: i32) -> (i32, i32) {
    %c0_i32 = arith.constant 0 : i32
    %c0_i32_0 = arith.constant 0 : i32
    %c0_i32_1 = arith.constant 0 : i32
    return %c0_i32, %c0_i32_0 : i32, i32
  }
}

</mosaic_0001>

<bundles_post_ra>
// kernel: tpu_custom_call.1
= control target key start
LH: loop header
LB: loop body
LE: loop exit
PB: predicated region body
PF: predicated region fallthrough
CT: control target
= control target key end

     0   :  { %14 = vsyncpa [#allocation4], 0  ;;  %s2288_s0 = inlined_call_operand.vmem [shape: bf16[128,128], index: 0, kind: input, shape index: {}]   ;;  %s2289_s1 = inlined_call_operand.vmem [shape: f32[128,1], index: 1, kind: input, shape index: {}]   ;;  %s2290_s2 = inlined_call_operand.vmem [shape: bf16[128,128], index: 2, kind: input, shape index: {}]   ;;  %s2291_s3 = inlined_call_operand.hbm [shape: bf16[128,128], index: 3, kind: input, shape index: {}]   ;;  %s2292_s4 = inlined_call_operand.hbm [shape: bf16[128,128], index: 4, kind: input, shape index: {}]   ;;  %s2293_s5 = inlined_call_operand.vmem [shape: f32[1,128], index: 5, kind: input, shape index: {}]   ;;  %s2294_s6 = inlined_call_operand.hbm [shape: bf16[128,128], index: 6, kind: input, shape index: {}]   ;;  %s2295_s7 = inlined_call_operand.hbm [shape: bf16[128,128], index: 7, kind: input, shape index: {}]   ;;  %s2296_s8 = inlined_call_operand.vmem [shape: f32[1,128], index: 8, kind: input, shape index: {}]   ;;  %s2297_s9 = inlined_call_operand.hbm [shape: f32[128,128], index: 9, kind: output, shape index: {}]  }
   0x1   :  { %15 = vsyncpa [#allocation7], 0 }
   0x2   :  { %16 = vsyncpa [#allocation10], 0 }
   0x3   :  { %17 = vsyncpa [#allocation5], 0  ;;  %s1868_s30 = smov [#allocation6]   ;;  %s1869_s11 = smov [#allocation3]  }
   0x4   :  { %s41_s10 = sshll.u32 %s1868_s30, 4  ;;  %s29_s12 = sshll.u32 %s1869_s11, 4  ;;  %s42_s10 = int_to_ptr.vmem [resolvable:$true] %s41_s10  ;;  %s1928_s12 = int_to_ptr.vmem [resolvable:$true] %s29_s12 }
   0x5   :  { %s1750_s15 = scalar_lea.hbm %s2292_s4, 1024 }
   0x6   :  { %p1751_p0 = scmp.ne.s32.totalorder %s2292_s4, %s1750_s15  ;;  %p1754_p1 = scmp.lt.u32.totalorder %s1750_s15, %s2292_s4 }
   0x8   :  { %p1756_p2 = pnand %p1754_p1, %p1751_p0 }
   0xa   :  { %1759 = shalt.err (!%p1756_p2)
}
   0xb   :  { %s1760_s20 = scalar_lea.vmem %s42_s10, 1024  ;;  %p1765_p4 = scmp.lt.s32.totalorder %s42_s10, %s42_s10 }
   0xc   :  { %p1761_p3 = scmp.ne.s32.totalorder %s42_s10, %s1760_s20  ;;  %p1766_p5 = scmp.lt.s32.totalorder %s1760_s20, %s1760_s20 }
   0xe   :  { %p1767_p6 = por %p1766_p5, %p1765_p4 }
  0x10   :  { %p1768_p7 = pnand %p1767_p6, %p1761_p3 }
  0x12   :  { %1771 = shalt.err (!%p1768_p7)
}
  0x13   :  { %s1870_s21 = smov 64   ;;  %s1871_s22 = smov 4  }
  0x14   :  { %47 = dma.hbm_to_vmem [thread:$0]  %s2292_s4, 1024, %s42_s10, [#allocation7], %s1870_s21, %s1870_s21, %s1871_s22  }
  0x15   :  { %s1772_s27 = scalar_lea.hbm %s2291_s3, 1024 }
  0x16   :  { %p1773_p8 = scmp.ne.s32.totalorder %s2291_s3, %s1772_s27  ;;  %p1776_p9 = scmp.lt.u32.totalorder %s1772_s27, %s2291_s3 }
  0x18   :  { %p1778_p10 = pnand %p1776_p9, %p1773_p8 }
  0x1a   :  { %1781 = shalt.err (!%p1778_p10)
}
  0x1b   :  { %s1782_s13 = scalar_lea.vmem %s1928_s12, 1024  ;;  %p1787_p12 = scmp.lt.s32.totalorder %s1928_s12, %s1928_s12 }
  0x1c   :  { %p1783_p11 = scmp.ne.s32.totalorder %s1928_s12, %s1782_s13  ;;  %p1788_p13 = scmp.lt.s32.totalorder %s1782_s13, %s1782_s13 }
  0x1e   :  { %p1789_p0 = por %p1788_p13, %p1787_p12 }
  0x20   :  { %p1790_p1 = pnand %p1789_p0, %p1783_p11 }
  0x22   :  { %1793 = shalt.err (!%p1790_p1)
}
  0x23   :  { %35 = dma.hbm_to_vmem [thread:$0]  %s2291_s3, 1024, %s1928_s12, [#allocation4], %s1870_s21, %s1870_s21, %s1871_s22  }
  0x24   :  { %s1872_s14 = smov [#allocation8]   ;;  %s1873_s16 = smov [#allocation9]  }
  0x25   :  { %s55_s15 = sshll.u32 %s1872_s14, 4  ;;  %s67_s17 = sshll.u32 %s1873_s16, 4  ;;  %s56_s15 = int_to_ptr.vmem [resolvable:$true] %s55_s15  ;;  %s1965_s17 = int_to_ptr.vmem [resolvable:$true] %s67_s17 }
  0x26   :  { %s1794_s20 = scalar_lea.hbm %s2294_s6, 1024 }
  0x27   :  { %p1795_p2 = scmp.ne.s32.totalorder %s2294_s6, %s1794_s20  ;;  %p1798_p3 = scmp.lt.u32.totalorder %s1794_s20, %s2294_s6 }
  0x29   :  { %p1800_p4 = pnand %p1798_p3, %p1795_p2 }
  0x2b   :  { %1803 = shalt.err (!%p1800_p4)
}
  0x2c   :  { %s1804_s3 = scalar_lea.vmem %s56_s15, 1024  ;;  %p1809_p6 = scmp.lt.s32.totalorder %s56_s15, %s56_s15 }
  0x2d   :  { %p1805_p5 = scmp.ne.s32.totalorder %s56_s15, %s1804_s3  ;;  %p1810_p7 = scmp.lt.s32.totalorder %s1804_s3, %s1804_s3 }
  0x2f   :  { %p1811_p8 = por %p1810_p7, %p1809_p6 }
  0x31   :  { %p1812_p9 = pnand %p1811_p8, %p1805_p5 }
  0x33   :  { %1815 = shalt.err (!%p1812_p9)
}
  0x34   :  { %61 = dma.hbm_to_vmem [thread:$0]  %s2294_s6, 1024, %s56_s15, [#allocation7], %s1870_s21, %s1870_s21, %s1871_s22  }
  0x35   :  { %s1816_s30 = scalar_lea.hbm %s2295_s7, 1024 }
  0x36   :  { %p1817_p10 = scmp.ne.s32.totalorder %s2295_s7, %s1816_s30  ;;  %p1820_p11 = scmp.lt.u32.totalorder %s1816_s30, %s2295_s7 }
  0x38   :  { %p1822_p12 = pnand %p1820_p11, %p1817_p10 }
  0x3a   :  { %1825 = shalt.err (!%p1822_p12)
}
  0x3b   :  { %s1826_s14 = scalar_lea.vmem %s1965_s17, 1024  ;;  %p1831_p0 = scmp.lt.s32.totalorder %s1965_s17, %s1965_s17 }
  0x3c   :  { %p1827_p13 = scmp.ne.s32.totalorder %s1965_s17, %s1826_s14  ;;  %p1832_p1 = scmp.lt.s32.totalorder %s1826_s14, %s1826_s14 }
  0x3e   :  { %p1833_p2 = por %p1832_p1, %p1831_p0 }
  0x40   :  { %p1834_p3 = pnand %p1833_p2, %p1827_p13 }
  0x42   :  { %1837 = shalt.err (!%p1834_p3)
}
  0x43   :  { %73 = dma.hbm_to_vmem [thread:$0]  %s2295_s7, 1024, %s1965_s17, [#allocation10], %s1870_s21, %s1870_s21, %s1871_s22  }
  0x44   :  { %1860 = dma.done.wait [#allocation4], 1024  }
  0x45   :  { %1861 = vsyncadd [#allocation4], 4294966272 }
  0x46   :  { %1862 = dma.done.wait [#allocation7], 2048  }
  0x47   :  { %1863 = vsyncadd [#allocation7], 4294965248 }
  0x48   :  { %1864 = dma.done.wait [#allocation10], 1024  }
  0x49   :  { %1865 = vsyncadd [#allocation10], 4294966272  ;;  %v1874_v0 = vmov 0   ;;  %v2005_v1 = vld [vmem:[%s2290_s2] sm:$0xff]   ;;  %v2010_v2 = vld [vmem:[%s2290_s2 + $0x8] sm:$0xff]  }
  0x4a   :  { %1700 = vset.pattern.permute.xlu0 %v1874_v0  ;;  %1701 = vset.pattern.permute.xlu1 %v1874_v0  ;;  %v2018_v3 = vld [vmem:[%s2290_s2 + $0x10] sm:$0xff]   ;;  %v2024_v4 = vld [vmem:[%s2290_s2 + $0x18] sm:$0xff]   ;;  %v1710_v5 = vld [vmem:[%s2288_s0] sm:$0xff]  }
  0x4b   :  { %1466 = vmatprep.subr.bf16.mxu1 %v2005_v1  ;;  %1482 = vmatprep.mubr.bf16.mxu1 %v1710_v5  ;;  %v2035_v6 = vld [vmem:[%s2290_s2 + $0x20] sm:$0xff]   ;;  %v2042_v7 = vld [vmem:[%s2290_s2 + $0x28] sm:$0xff]   ;;  %v107_v9 = vld [vmem:[%s2289_s1 + $0x10] sm:$0xff] }
  0x4c   :  { %1467 = vmatpush3.bf16.msra.mxu1 %v2005_v1  ;;  %1578 = vmatprep.mubr.bf16.mxu0 %v1710_v5  ;;  %v105_v8 = vld [vmem:[%s2289_s1] sm:$0xff]  ;;  %v106_v10 = vld [vmem:[%s2289_s1 + $0x8] sm:$0xff]  ;;  %v108_v11 = vld [vmem:[%s2289_s1 + $0x18] sm:$0xff] }
  0x4d   :  { %1468 = vmatprep.subr.bf16.mxu1 %v2010_v2  ;;  %332 = vperm.xlu0 %1700, %v105_v8   ;;  %v2061_v12 = vld [vmem:[%s2290_s2 + $0x30] sm:$0xff]   ;;  %v109_v13 = vld [vmem:[%s2289_s1 + $0x20] sm:$0xff]  ;;  %v2069_v14 = vld [vmem:[%s2290_s2 + $0x38] sm:$0xff]  }
  0x4e   :  { %342 = vperm.xlu1 %1701, %v107_v9   ;;  %v110_v15 = vld [vmem:[%s2289_s1 + $0x28] sm:$0xff]  ;;  %v111_v16 = vld [vmem:[%s2289_s1 + $0x30] sm:$0xff]  ;;  %v112_v17 = vld [vmem:[%s2289_s1 + $0x38] sm:$0xff] }
  0x4f   :  { %v2087_v18 = vld [vmem:[%s2288_s0 + $0x8] sm:$0xff]   ;;  %v113_v19 = vld [vmem:[%s2289_s1 + $0x40] sm:$0xff]  ;;  %v2098_v22 = vld [vmem:[%s2288_s0 + $0x10] sm:$0xff]  }
  0x50   :  { %1469 = vmatpush3.bf16.msra.mxu1 %v2010_v2  ;;  %v114_v20 = vld [vmem:[%s2289_s1 + $0x48] sm:$0xff]  ;;  %v1718_v21 = vld [vmem:[#allocation6] sm:$0xff]   ;;  %v115_v23 = vld [vmem:[%s2289_s1 + $0x50] sm:$0xff] }
  0x51   :  { %1470 = vmatprep.subr.bf16.mxu1 %v2018_v3  ;;  %337 = vperm.xlu0 %1700, %v106_v10   ;;  %v116_v24 = vld [vmem:[%s2289_s1 + $0x58] sm:$0xff]  ;;  %v1719_v25 = vld [vmem:[#allocation6 + $0x8] sm:$0xff]   ;;  %v117_v27 = vld [vmem:[%s2289_s1 + $0x60] sm:$0xff] }
  0x52   :  { %347 = vperm.xlu1 %1701, %v108_v11   ;;  %v2112_v26 = vld [vmem:[%s2288_s0 + $0x18] sm:$0xff]   ;;  %v118_v28 = vld [vmem:[%s2289_s1 + $0x68] sm:$0xff]  ;;  %v1720_v29 = vld [vmem:[#allocation6 + $0x10] sm:$0xff]  }
  0x53   :  { %v2123_v30 = vld [vmem:[%s2288_s0 + $0x20] sm:$0xff]   ;;  %v119_v31 = vld [vmem:[%s2289_s1 + $0x70] sm:$0xff]  ;;  %v120_v32 = vld [vmem:[%s2289_s1 + $0x78] sm:$0xff] }
  0x54   :  { %1471 = vmatpush3.bf16.msra.mxu1 %v2018_v3  ;;  %v1721_v33 = vld [vmem:[#allocation6 + $0x18] sm:$0xff]   ;;  %v1722_v34 = vld [vmem:[#allocation6 + $0x20] sm:$0xff]   ;;  %v2136_v35 = vld [vmem:[%s2288_s0 + $0x28] sm:$0xff]  }
  0x55   :  { %1472 = vmatprep.subr.bf16.mxu1 %v2024_v4  ;;  %352 = vperm.xlu0 %1700, %v109_v13   ;;  %v2141_v36 = vld [vmem:[%s2288_s0 + $0x30] sm:$0xff]   ;;  %v1723_v37 = vld [vmem:[#allocation6 + $0x28] sm:$0xff]   ;;  %v2148_v38 = vld [vmem:[%s2288_s0 + $0x38] sm:$0xff]  }
  0x56   :  { %357 = vperm.xlu1 %1701, %v110_v15   ;;  %v1724_v39 = vld [vmem:[#allocation6 + $0x30] sm:$0xff]   ;;  %v1725_v40 = vld [vmem:[#allocation6 + $0x38] sm:$0xff]   ;;  %v1726_v41 = vld [vmem:[#allocation3] sm:$0xff]  }
  0x57   :  { %v1727_v61 = vld [vmem:[#allocation3 + $0x8] sm:$0xff]   ;;  %v1728_v11 = vld [vmem:[#allocation3 + $0x10] sm:$0xff]  }
  0x58   :  { %1473 = vmatpush3.bf16.msra.mxu1 %v2024_v4 }
  0x59   :  { %1474 = vmatprep.subr.bf16.mxu1 %v2035_v6  ;;  %362 = vperm.xlu0 %1700, %v111_v16  }
  0x5a   :  { %367 = vperm.xlu1 %1701, %v112_v17  }
  0x5c   :  { %1475 = vmatpush3.bf16.msra.mxu1 %v2035_v6 }
  0x5d   :  { %1476 = vmatprep.subr.bf16.mxu1 %v2042_v7  ;;  %372 = vperm.xlu0 %1700, %v113_v19  }
  0x5e   :  { %377 = vperm.xlu1 %1701, %v114_v20  }
  0x60   :  { %1477 = vmatpush3.bf16.msra.mxu1 %v2042_v7 }
  0x61   :  { %1478 = vmatprep.subr.bf16.mxu1 %v2061_v12  ;;  %382 = vperm.xlu0 %1700, %v115_v23  }
  0x62   :  { %387 = vperm.xlu1 %1701, %v116_v24  }
  0x64   :  { %1479 = vmatpush3.bf16.msra.mxu1 %v2061_v12 }
  0x65   :  { %1480 = vmatprep.subr.bf16.mxu1 %v2069_v14  ;;  %392 = vperm.xlu0 %1700, %v117_v27  }
  0x66   :  { %397 = vperm.xlu1 %1701, %v118_v28  }
  0x68   :  { %1481 = vmatpush3.bf16.msra.mxu1 %v2069_v14 }
  0x69   :  { %1498 = vmatprep.subr.bf16.mxu1 %v1718_v21  ;;  %402 = vperm.xlu0 %1700, %v119_v31  }
  0x6a   :  { %407 = vperm.xlu1 %1701, %v120_v32   ;;  %v1730_v32 = vld [vmem:[#allocation3 + $0x20] sm:$0xff]  }
  0x6b   :  { %1483 = vmatmul.mubr.bf16.vlgmr.msra.gmra.mrb[0].mxu1 %v2087_v18 }
  0x6c   :  { %1486 = vmatprep.mubr.bf16.mxu1 %v2098_v22  ;;  %1499 = vmatpush3.bf16.msra.mxu1 %v1718_v21  ;;  %v1729_v21 = vld [vmem:[#allocation3 + $0x18] sm:$0xff]  }
  0x6d   :  { %1500 = vmatprep.subr.bf16.mxu1 %v1719_v25 }
  0x70   :  { %1501 = vmatpush3.bf16.msra.mxu1 %v1719_v25 }
  0x71   :  { %1502 = vmatprep.subr.bf16.mxu1 %v1720_v29 }
  0x73   :  { %1487 = vmatmul.mubr.bf16.gmra.mrb[4].mxu1 %v2112_v26 }
  0x74   :  { %1490 = vmatprep.mubr.bf16.mxu1 %v2123_v30  ;;  %1503 = vmatpush3.bf16.msra.mxu1 %v1720_v29 }
  0x75   :  { %1504 = vmatprep.subr.bf16.mxu1 %v1721_v33 }
  0x78   :  { %1505 = vmatpush3.bf16.msra.mxu1 %v1721_v33 }
  0x79   :  { %1506 = vmatprep.subr.bf16.mxu1 %v1722_v34 }
  0x7b   :  { %1491 = vmatmul.mubr.bf16.gmra.mrb[8].mxu1 %v2136_v35 }
  0x7c   :  { %1494 = vmatprep.mubr.bf16.mxu1 %v2141_v36  ;;  %1507 = vmatpush3.bf16.msra.mxu1 %v1722_v34 }
  0x7d   :  { %1508 = vmatprep.subr.bf16.mxu1 %v1723_v37 }
  0x80   :  { %1509 = vmatpush3.bf16.msra.mxu1 %v1723_v37 }
  0x81   :  { %1510 = vmatprep.subr.bf16.mxu1 %v1724_v39 }
  0x83   :  { %1495 = vmatmul.mubr.bf16.gmra.mrb[12].mxu1 %v2148_v38 }
  0x84   :  { %1511 = vmatpush3.bf16.msra.mxu1 %v1724_v39 }
  0x85   :  { %1512 = vmatprep.subr.bf16.mxu1 %v1725_v40 }
  0x88   :  { %1513 = vmatpush3.bf16.msra.mxu1 %v1725_v40 }
  0x89   :  { %1530 = vmatprep.subr.bf16.mxu1 %v1726_v41 }
  0xcc   :  { %v2151_v42 = vpop.permute.xlu0 %332 }
  0xcd   :  { %v2153_v43 = vpop.permute.xlu1 %342 }
  0xd0   :  { %v2155_v44 = vpop.permute.xlu0 %337 }
  0xd1   :  { %v2157_v45 = vpop.permute.xlu1 %347 }
  0xd4   :  { %v2159_v46 = vpop.permute.xlu0 %352 }
  0xd5   :  { %v2161_v47 = vpop.permute.xlu1 %357 }
  0xd8   :  { %v2163_v49 = vpop.permute.xlu0 %362 }
  0xd9   :  { %v2165_v51 = vpop.permute.xlu1 %367 }
  0xdc   :  { %v2171_v60 = vpop.permute.xlu0 %372 }
  0xdd   :  { %v2173_v62 = vpop.permute.xlu1 %377 }
  0xe0   :  { %v2179_v16 = vpop.permute.xlu0 %382 }
  0xe1   :  { %v2181_v19 = vpop.permute.xlu1 %387 }
  0xe4   :  { %v2183_v27 = vpop.permute.xlu0 %392 }
  0xe5   :  { %v2187_v33 = vpop.permute.xlu1 %397 }
 0x13e   :  { %v1484_v48 = vpop.f32.mrb[0].mxu1 }
 0x13f   :  { %v267_v50 = vpop.f32.mrb[1].mxu1  ;;  %v412_v53 = vmul.f32 %v1484_v48, %v2153_v43 }
 0x140   :  { %v1485_v52 = vpop.f32.mrb[2].mxu1  ;;  %v410_v56 = vmul.f32 %v2151_v42, %v267_v50  ;;  %v2191_v50 = vpop.permute.xlu0 %402 }
 0x141   :  { %v413_v54 = vmul.f32 %v1485_v52, %v2157_v45  ;;  %v270_v55 = vpop.f32.mrb[3].mxu1 }
 0x142   :  { %v411_v57 = vmul.f32 %v2155_v44, %v270_v55 }
 0x143   :  { %v443_v58 = vpack.c.bf16 %v413_v54, %v412_v53  ;;  %v2193_v53 = vpop.permute.xlu1 %407 }
 0x144   :  { %v442_v59 = vpack.c.bf16 %v411_v57, %v410_v56 }
 0x146   :  { %v1488_v63 = vpop.f32.mrb[4].mxu1  ;;  %1514 = vmatprep.mubr.bf16.mxu1 %v442_v59 }
 0x147   :  { %v283_v0 = vpop.f32.mrb[5].mxu1  ;;  %1515 = vmatmul.mubr.bf16.vlgmr.msra.gmra.mrb[16].mxu1 %v443_v58  ;;  %v416_v8 = vmul.f32 %v1488_v63, %v2163_v49  ;;  %v1732_v58 = vld [vmem:[#allocation3 + $0x30] sm:$0xff]  }
 0x148   :  { %1531 = vmatpush3.bf16.msra.mxu1 %v1726_v41  ;;  %v1489_v5 = vpop.f32.mrb[6].mxu1  ;;  %v414_v13 = vmul.f32 %v2159_v46, %v283_v0  ;;  %v1731_v41 = vld [vmem:[#allocation3 + $0x28] sm:$0xff]  }
 0x149   :  { %v417_v9 = vmul.f32 %v1489_v5, %v2165_v51  ;;  %v286_v10 = vpop.f32.mrb[7].mxu1  ;;  %1532 = vmatprep.subr.bf16.mxu1 %v1727_v61  ;;  %v1733_v5 = vld [vmem:[#allocation3 + $0x38] sm:$0xff]  }
 0x14a   :  { %v415_v15 = vmul.f32 %v2161_v47, %v286_v10 }
 0x14b   :  { %v445_v17 = vpack.c.bf16 %v417_v9, %v416_v8 }
 0x14c   :  { %v444_v20 = vpack.c.bf16 %v415_v15, %v414_v13  ;;  %1533 = vmatpush3.bf16.msra.mxu1 %v1727_v61 }
 0x14d   :  { %1534 = vmatprep.subr.bf16.mxu1 %v1728_v11 }
 0x14e   :  { %v1492_v23 = vpop.f32.mrb[8].mxu1  ;;  %1518 = vmatprep.mubr.bf16.mxu1 %v444_v20 }
 0x14f   :  { %v299_v24 = vpop.f32.mrb[9].mxu1  ;;  %1519 = vmatmul.mubr.bf16.gmra.mrb[20].mxu1 %v445_v17  ;;  %v420_v28 = vmul.f32 %v1492_v23, %v2179_v16 }
 0x150   :  { %1535 = vmatpush3.bf16.msra.mxu1 %v1728_v11  ;;  %v1493_v25 = vpop.f32.mrb[10].mxu1  ;;  %v418_v34 = vmul.f32 %v2171_v60, %v299_v24 }
 0x151   :  { %v421_v29 = vmul.f32 %v1493_v25, %v2181_v19  ;;  %v302_v31 = vpop.f32.mrb[11].mxu1  ;;  %1536 = vmatprep.subr.bf16.mxu1 %v1729_v21 }
 0x152   :  { %v419_v37 = vmul.f32 %v2173_v62, %v302_v31 }
 0x153   :  { %v447_v39 = vpack.c.bf16 %v421_v29, %v420_v28 }
 0x154   :  { %v446_v40 = vpack.c.bf16 %v419_v37, %v418_v34  ;;  %1537 = vmatpush3.bf16.msra.mxu1 %v1729_v21 }
 0x155   :  { %1538 = vmatprep.subr.bf16.mxu1 %v1730_v32 }
 0x156   :  { %v1496_v48 = vpop.f32.mrb[12].mxu1  ;;  %1522 = vmatprep.mubr.bf16.mxu1 %v446_v40 }
 0x157   :  { %v315_v52 = vpop.f32.mrb[13].mxu1  ;;  %1523 = vmatmul.mubr.bf16.gmra.mrb[24].mxu1 %v447_v39  ;;  %v424_v55 = vmul.f32 %v1496_v48, %v2191_v50 }
 0x158   :  { %1539 = vmatpush3.bf16.msra.mxu1 %v1730_v32  ;;  %v1497_v54 = vpop.f32.mrb[14].mxu1  ;;  %v422_v59 = vmul.f32 %v2183_v27, %v315_v52 }
 0x159   :  { %v425_v56 = vmul.f32 %v1497_v54, %v2193_v53  ;;  %v318_v57 = vpop.f32.mrb[15].mxu1  ;;  %1540 = vmatprep.subr.bf16.mxu1 %v1731_v41 }
 0x15a   :  { %v423_v61 = vmul.f32 %v2187_v33, %v318_v57 }
 0x15b   :  { %v449_v63 = vpack.c.bf16 %v425_v56, %v424_v55 }
 0x15c   :  { %v448_v0 = vpack.c.bf16 %v423_v61, %v422_v59  ;;  %1541 = vmatpush3.bf16.msra.mxu1 %v1731_v41 }
 0x15d   :  { %1542 = vmatprep.subr.bf16.mxu1 %v1732_v58 }
 0x15e   :  { %1526 = vmatprep.mubr.bf16.mxu1 %v448_v0 }
 0x15f   :  { %1527 = vmatmul.mubr.bf16.gmra.mrb[28].mxu1 %v449_v63 }
 0x160   :  { %1543 = vmatpush3.bf16.msra.mxu1 %v1732_v58  ;;  %1546 = vmatprep.mubr.bf16.mxu1 %v2005_v1  ;;  %v1352_v1 = vld [vmem:[%s2293_s5] ss:$0 sm:$0xff] }
 0x161   :  { %1544 = vmatprep.subr.bf16.mxu1 %v1733_v5 }
 0x164   :  { %1545 = vmatpush3.bf16.msra.mxu1 %v1733_v5 }
 0x167   :  { %1547 = vmatmul.mubr.bf16.vlgmr.msra.gmra.mrb[16].mxu1 %v2010_v2 }
 0x168   :  { %1550 = vmatprep.mubr.bf16.mxu1 %v2018_v3 }
 0x16f   :  { %1551 = vmatmul.mubr.bf16.gmra.mrb[20].mxu1 %v2024_v4 }
 0x170   :  { %1554 = vmatprep.mubr.bf16.mxu1 %v2035_v6 }
 0x177   :  { %1555 = vmatmul.mubr.bf16.gmra.mrb[24].mxu1 %v2042_v7 }
 0x178   :  { %1558 = vmatprep.mubr.bf16.mxu1 %v2061_v12 }
 0x17f   :  { %1559 = vmatmul.mubr.bf16.gmra.mrb[28].mxu1 %v2069_v14 }
 0x23a   :  { %v1548_v8 = vpop.f32.mrb[16].mxu1 }
 0x23b   :  { %v765_v9 = vadd.f32 %v1548_v8, %v1352_v1  ;;  %v693_v10 = vpop.f32.mrb[17].mxu1 }
 0x23c   :  { %v763_v2 = vadd.f32 %v1352_v1, %v693_v10  ;;  %v1549_v11 = vpop.f32.mrb[18].mxu1 }
 0x23d   :  { %v766_v3 = vadd.f32 %v1549_v11, %v1352_v1  ;;  %v696_v13 = vpop.f32.mrb[19].mxu1  ;;  %v781_v15 = vmax.f32 %v765_v9, 0.0 }
 0x23e   :  { %v764_v4 = vadd.f32 %v1352_v1, %v696_v13  ;;  %v779_v17 = vmax.f32 %v763_v2, 0.0 }
 0x23f   :  { %v782_v6 = vmax.f32 %v766_v3, 0.0 }
 0x240   :  { %v780_v7 = vmax.f32 %v764_v4, 0.0 }
 0x241   :  { %v2210_v20 = vpack.c.bf16 %v782_v6, %v781_v15 }
 0x242   :  { %v2212_v12 = vpack.c.bf16 %v780_v7, %v779_v17  ;;  %v1552_v14 = vpop.f32.mrb[20].mxu1 }
 0x243   :  { %v769_v21 = vadd.f32 %v1552_v14, %v1352_v1  ;;  %v709_v23 = vpop.f32.mrb[21].mxu1 }
 0x244   :  { %v767_v24 = vadd.f32 %v1352_v1, %v709_v23  ;;  %v1553_v25 = vpop.f32.mrb[22].mxu1  ;;  %1562 = vmatprep.subr.bf16.mxu0 %v2212_v12 }
 0x245   :  { %v770_v28 = vadd.f32 %v1553_v25, %v1352_v1  ;;  %v712_v29 = vpop.f32.mrb[23].mxu1  ;;  %1563 = vmatpush3.bf16.msra.mxu0 %v2212_v12  ;;  %v785_v32 = vmax.f32 %v769_v21, 0.0  ;;  %v1734_v25 = vld [vmem:[#allocation9] sm:$0xff]  }
 0x246   :  { %v768_v31 = vadd.f32 %v1352_v1, %v712_v29  ;;  %1564 = vmatprep.subr.bf16.mxu0 %v2210_v20  ;;  %v783_v37 = vmax.f32 %v767_v24, 0.0  ;;  %v1737_v29 = vld [vmem:[#allocation9 + $0x18] sm:$0xff]  }
 0x247   :  { %v786_v34 = vmax.f32 %v770_v28, 0.0  ;;  %v1736_v28 = vld [vmem:[#allocation9 + $0x10] sm:$0xff]  }
 0x248   :  { %v784_v39 = vmax.f32 %v768_v31, 0.0  ;;  %v1738_v31 = vld [vmem:[#allocation9 + $0x20] sm:$0xff]  }
 0x249   :  { %v2217_v40 = vpack.c.bf16 %v786_v34, %v785_v32  ;;  %1565 = vmatpush3.bf16.msra.mxu0 %v2210_v20  ;;  %v1739_v32 = vld [vmem:[#allocation9 + $0x28] sm:$0xff]  }
 0x24a   :  { %v2220_v41 = vpack.c.bf16 %v784_v39, %v783_v37  ;;  %v1556_v48 = vpop.f32.mrb[24].mxu1 }
 0x24b   :  { %v773_v52 = vadd.f32 %v1556_v48, %v1352_v1  ;;  %v725_v54 = vpop.f32.mrb[25].mxu1 }
 0x24c   :  { %v771_v55 = vadd.f32 %v1352_v1, %v725_v54  ;;  %v1557_v56 = vpop.f32.mrb[26].mxu1  ;;  %1566 = vmatprep.subr.bf16.mxu0 %v2220_v41 }
 0x24d   :  { %v774_v57 = vadd.f32 %v1557_v56, %v1352_v1  ;;  %v728_v58 = vpop.f32.mrb[27].mxu1  ;;  %1567 = vmatpush3.bf16.msra.mxu0 %v2220_v41  ;;  %v789_v61 = vmax.f32 %v773_v52, 0.0 }
 0x24e   :  { %v772_v59 = vadd.f32 %v1352_v1, %v728_v58  ;;  %1568 = vmatprep.subr.bf16.mxu0 %v2217_v40  ;;  %v787_v0 = vmax.f32 %v771_v55, 0.0  ;;  %v1743_v55 = vld [vmem:[#allocation8 + $0x8] sm:$0xff]  }
 0x24f   :  { %v790_v63 = vmax.f32 %v774_v57, 0.0 }
 0x250   :  { %v788_v5 = vmax.f32 %v772_v59, 0.0 }
 0x251   :  { %v2225_v8 = vpack.c.bf16 %v790_v63, %v789_v61  ;;  %1569 = vmatpush3.bf16.msra.mxu0 %v2217_v40 }
 0x252   :  { %v2228_v9 = vpack.c.bf16 %v788_v5, %v787_v0  ;;  %v1560_v10 = vpop.f32.mrb[28].mxu1  ;;  %v1745_v5 = vld [vmem:[#allocation8 + $0x18] sm:$0xff]  }
 0x253   :  { %v777_v2 = vadd.f32 %v1560_v10, %v1352_v1  ;;  %v741_v11 = vpop.f32.mrb[29].mxu1 }
 0x254   :  { %v775_v3 = vadd.f32 %v1352_v1, %v741_v11  ;;  %v1561_v13 = vpop.f32.mrb[30].mxu1  ;;  %1570 = vmatprep.subr.bf16.mxu0 %v2228_v9 }
 0x255   :  { %v778_v4 = vadd.f32 %v1561_v13, %v1352_v1  ;;  %v744_v15 = vpop.f32.mrb[31].mxu1  ;;  %1571 = vmatpush3.bf16.msra.mxu0 %v2228_v9  ;;  %v793_v17 = vmax.f32 %v777_v2, 0.0 }
 0x256   :  { %v776_v6 = vadd.f32 %v1352_v1, %v744_v15  ;;  %1572 = vmatprep.subr.bf16.mxu0 %v2225_v8  ;;  %v791_v14 = vmax.f32 %v775_v3, 0.0  ;;  %v1735_v1 = vld [vmem:[#allocation9 + $0x8] sm:$0xff]  }
 0x257   :  { %v794_v7 = vmax.f32 %v778_v4, 0.0 }
 0x258   :  { %v792_v21 = vmax.f32 %v776_v6, 0.0  ;;  %v1747_v6 = vld [vmem:[#allocation8 + $0x28] sm:$0xff]  }
 0x259   :  { %v2233_v23 = vpack.c.bf16 %v794_v7, %v793_v17  ;;  %1573 = vmatpush3.bf16.msra.mxu0 %v2225_v8 }
 0x25a   :  { %v2236_v24 = vpack.c.bf16 %v792_v21, %v791_v14 }
 0x25c   :  { %1574 = vmatprep.subr.bf16.mxu0 %v2236_v24 }
 0x25d   :  { %1575 = vmatpush3.bf16.msra.mxu0 %v2236_v24 }
 0x25e   :  { %1576 = vmatprep.subr.bf16.mxu0 %v2233_v23 }
 0x261   :  { %1577 = vmatpush3.bf16.msra.mxu0 %v2233_v23 }
 0x262   :  { %1594 = vmatprep.subr.bf16.mxu0 %v1734_v25 }
 0x264   :  { %1579 = vmatmul.mubr.bf16.vlgmr.msra.gmra.mrb[0].mxu0 %v2087_v18  ;;  %v1740_v18 = vld [vmem:[#allocation9 + $0x30] sm:$0xff]  }
 0x265   :  { %1582 = vmatprep.mubr.bf16.mxu0 %v2098_v22  ;;  %1595 = vmatpush3.bf16.msra.mxu0 %v1734_v25  ;;  %v1741_v22 = vld [vmem:[#allocation9 + $0x38] sm:$0xff]  }
 0x266   :  { %1596 = vmatprep.subr.bf16.mxu0 %v1735_v1 }
 0x269   :  { %1597 = vmatpush3.bf16.msra.mxu0 %v1735_v1 }
 0x26a   :  { %1598 = vmatprep.subr.bf16.mxu0 %v1736_v28 }
 0x26c   :  { %1583 = vmatmul.mubr.bf16.gmra.mrb[4].mxu0 %v2112_v26  ;;  %v1742_v26 = vld [vmem:[#allocation8] sm:$0xff]  }
 0x26d   :  { %1586 = vmatprep.mubr.bf16.mxu0 %v2123_v30  ;;  %1599 = vmatpush3.bf16.msra.mxu0 %v1736_v28 }
 0x26e   :  { %1600 = vmatprep.subr.bf16.mxu0 %v1737_v29 }
 0x271   :  { %1601 = vmatpush3.bf16.msra.mxu0 %v1737_v29  ;;  %v1749_v29 = vld [vmem:[#allocation8 + $0x38] sm:$0xff]  }
 0x272   :  { %1602 = vmatprep.subr.bf16.mxu0 %v1738_v31 }
 0x274   :  { %1587 = vmatmul.mubr.bf16.gmra.mrb[8].mxu0 %v2136_v35 }
 0x275   :  { %1590 = vmatprep.mubr.bf16.mxu0 %v2141_v36  ;;  %1603 = vmatpush3.bf16.msra.mxu0 %v1738_v31 }
 0x276   :  { %1604 = vmatprep.subr.bf16.mxu0 %v1739_v32 }
 0x279   :  { %1605 = vmatpush3.bf16.msra.mxu0 %v1739_v32 }
 0x27a   :  { %1606 = vmatprep.subr.bf16.mxu0 %v1740_v18 }
 0x27c   :  { %1591 = vmatmul.mubr.bf16.gmra.mrb[12].mxu0 %v2148_v38 }
 0x27d   :  { %1607 = vmatpush3.bf16.msra.mxu0 %v1740_v18 }
 0x27e   :  { %1608 = vmatprep.subr.bf16.mxu0 %v1741_v22 }
 0x281   :  { %1609 = vmatpush3.bf16.msra.mxu0 %v1741_v22 }
 0x282   :  { %1626 = vmatprep.subr.bf16.mxu0 %v1742_v26 }
 0x337   :  { %v1580_v30 = vpop.f32.mrb[0].mxu0 }
 0x338   :  { %v853_v34 = vpop.f32.mrb[1].mxu0  ;;  %v918_v35 = vmul.f32 %v1580_v30, %v2153_v43 }
 0x339   :  { %v1581_v37 = vpop.f32.mrb[2].mxu0  ;;  %v916_v48 = vmul.f32 %v853_v34, %v2151_v42 }
 0x33a   :  { %v919_v36 = vmul.f32 %v1581_v37, %v2157_v45  ;;  %v856_v39 = vpop.f32.mrb[3].mxu0  ;;  %v1744_v45 = vld [vmem:[#allocation8 + $0x10] sm:$0xff]  }
 0x33b   :  { %v917_v38 = vmul.f32 %v856_v39, %v2155_v44 }
 0x33c   :  { %v949_v52 = vpack.c.bf16 %v919_v36, %v918_v35 }
 0x33d   :  { %v948_v54 = vpack.c.bf16 %v917_v38, %v916_v48 }
 0x33f   :  { %v1584_v56 = vpop.f32.mrb[4].mxu0  ;;  %1610 = vmatprep.mubr.bf16.mxu0 %v948_v54 }
 0x340   :  { %v869_v57 = vpop.f32.mrb[5].mxu0  ;;  %1611 = vmatmul.mubr.bf16.vlgmr.msra.gmra.mrb[16].mxu0 %v949_v52  ;;  %v922_v59 = vmul.f32 %v1584_v56, %v2163_v49 }
 0x341   :  { %1627 = vmatpush3.bf16.msra.mxu0 %v1742_v26  ;;  %v1585_v58 = vpop.f32.mrb[6].mxu0  ;;  %v920_v42 = vmul.f32 %v869_v57, %v2159_v46  ;;  %v1746_v46 = vld [vmem:[#allocation8 + $0x20] sm:$0xff]  }
 0x342   :  { %v923_v43 = vmul.f32 %v1585_v58, %v2165_v51  ;;  %v872_v61 = vpop.f32.mrb[7].mxu0  ;;  %1628 = vmatprep.subr.bf16.mxu0 %v1743_v55 }
 0x343   :  { %v921_v44 = vmul.f32 %v872_v61, %v2161_v47 }
 0x344   :  { %v951_v63 = vpack.c.bf16 %v923_v43, %v922_v59 }
 0x345   :  { %v950_v0 = vpack.c.bf16 %v921_v44, %v920_v42  ;;  %1629 = vmatpush3.bf16.msra.mxu0 %v1743_v55 }
 0x346   :  { %1630 = vmatprep.subr.bf16.mxu0 %v1744_v45 }
 0x347   :  { %v1588_v10 = vpop.f32.mrb[8].mxu0  ;;  %1614 = vmatprep.mubr.bf16.mxu0 %v950_v0 }
 0x348   :  { %v885_v2 = vpop.f32.mrb[9].mxu0  ;;  %1615 = vmatmul.mubr.bf16.gmra.mrb[20].mxu0 %v951_v63  ;;  %v926_v51 = vmul.f32 %v1588_v10, %v2179_v16 }
 0x349   :  { %1631 = vmatpush3.bf16.msra.mxu0 %v1744_v45  ;;  %v1589_v49 = vpop.f32.mrb[10].mxu0  ;;  %v924_v47 = vmul.f32 %v885_v2, %v2171_v60  ;;  %v1748_v60 = vld [vmem:[#allocation8 + $0x30] sm:$0xff]  }
 0x34a   :  { %v927_v11 = vmul.f32 %v1589_v49, %v2181_v19  ;;  %v888_v3 = vpop.f32.mrb[11].mxu0  ;;  %1632 = vmatprep.subr.bf16.mxu0 %v1745_v5 }
 0x34b   :  { %v925_v13 = vmul.f32 %v888_v3, %v2173_v62 }
 0x34c   :  { %v953_v4 = vpack.c.bf16 %v927_v11, %v926_v51 }
 0x34d   :  { %v952_v15 = vpack.c.bf16 %v925_v13, %v924_v47  ;;  %1633 = vmatpush3.bf16.msra.mxu0 %v1745_v5 }
 0x34e   :  { %1634 = vmatprep.subr.bf16.mxu0 %v1746_v46 }
 0x34f   :  { %v1592_v17 = vpop.f32.mrb[12].mxu0  ;;  %1618 = vmatprep.mubr.bf16.mxu0 %v952_v15 }
 0x350   :  { %v901_v7 = vpop.f32.mrb[13].mxu0  ;;  %1619 = vmatmul.mubr.bf16.gmra.mrb[24].mxu0 %v953_v4  ;;  %v930_v19 = vmul.f32 %v1592_v17, %v2191_v50 }
 0x351   :  { %1635 = vmatpush3.bf16.msra.mxu0 %v1746_v46  ;;  %v1593_v16 = vpop.f32.mrb[14].mxu0  ;;  %v928_v62 = vmul.f32 %v901_v7, %v2183_v27  ;;  %v1369_v27 = vld [vmem:[%s2296_s8] ss:$0 sm:$0xff]  ;;  %s1875_s8 = smov [#allocation11]  }
 0x352   :  { %v931_v14 = vmul.f32 %v1593_v16, %v2193_v53  ;;  %v904_v21 = vpop.f32.mrb[15].mxu0  ;;  %1636 = vmatprep.subr.bf16.mxu0 %v1747_v6  ;;  %s1306_s12 = sshll.u32 %s1875_s8, 4  ;;  %s1307_s12 = int_to_ptr.vmem [resolvable:$true] %s1306_s12 }
 0x353   :  { %v929_v25 = vmul.f32 %v904_v21, %v2187_v33  ;;  %s1838_s27 = scalar_lea.vmem %s1307_s12, 2048  ;;  %p1843_p5 = scmp.lt.s32.totalorder %s1307_s12, %s1307_s12 }
 0x354   :  { %v955_v1 = vpack.c.bf16 %v931_v14, %v930_v19  ;;  %p1839_p4 = scmp.ne.s32.totalorder %s1307_s12, %s1838_s27  ;;  %p1844_p6 = scmp.lt.s32.totalorder %s1838_s27, %s1838_s27 }
 0x355   :  { %v954_v28 = vpack.c.bf16 %v929_v25, %v928_v62  ;;  %1637 = vmatpush3.bf16.msra.mxu0 %v1747_v6 }
 0x356   :  { %1638 = vmatprep.subr.bf16.mxu0 %v1748_v60  ;;  %p1845_p7 = por %p1844_p6, %p1843_p5 }
 0x357   :  { %1622 = vmatprep.mubr.bf16.mxu0 %v954_v28 }
 0x358   :  { %1623 = vmatmul.mubr.bf16.gmra.mrb[28].mxu0 %v955_v1  ;;  %p1846_p8 = pnand %p1845_p7, %p1839_p4 }
 0x359   :  { %1639 = vmatpush3.bf16.msra.mxu0 %v1748_v60  ;;  %1642 = vmatprep.mubr.bf16.mxu0 %v2212_v12 }
 0x35a   :  { %1640 = vmatprep.subr.bf16.mxu0 %v1749_v29 }
 0x35d   :  { %1641 = vmatpush3.bf16.msra.mxu0 %v1749_v29 }
 0x360   :  { %1643 = vmatmul.mubr.bf16.vlgmr.msra.gmra.mrb[16].mxu0 %v2210_v20 }
 0x361   :  { %1646 = vmatprep.mubr.bf16.mxu0 %v2220_v41 }
 0x368   :  { %1647 = vmatmul.mubr.bf16.gmra.mrb[20].mxu0 %v2217_v40 }
 0x369   :  { %1650 = vmatprep.mubr.bf16.mxu0 %v2228_v9 }
 0x370   :  { %1651 = vmatmul.mubr.bf16.gmra.mrb[24].mxu0 %v2225_v8 }
 0x371   :  { %1654 = vmatprep.mubr.bf16.mxu0 %v2236_v24 }
 0x378   :  { %1655 = vmatmul.mubr.bf16.gmra.mrb[28].mxu0 %v2233_v23 }
 0x433   :  { %v1644_v33 = vpop.f32.mrb[16].mxu0 }
 0x434   :  { %v1271_v50 = vadd.f32 %v1644_v33, %v1369_v27  ;;  %v1199_v53 = vpop.f32.mrb[17].mxu0 }
 0x435   :  { %v1269_v20 = vadd.f32 %v1369_v27, %v1199_v53  ;;  %v1645_v12 = vpop.f32.mrb[18].mxu0 }
 0x436   :  { %1287 = vst [vmem:[#allocation11 + $0x10] sm:$0xff] %v1271_v50  ;;  %v1272_v41 = vadd.f32 %v1645_v12, %v1369_v27  ;;  %v1202_v40 = vpop.f32.mrb[19].mxu0 }
 0x437   :  { %1285 = vst [vmem:[#allocation11] sm:$0xff] %v1269_v20  ;;  %v1270_v9 = vadd.f32 %v1369_v27, %v1202_v40 }
 0x438   :  { %1288 = vst [vmem:[#allocation11 + $0x18] sm:$0xff] %v1272_v41 }
 0x439   :  { %1286 = vst [vmem:[#allocation11 + $0x8] sm:$0xff] %v1270_v9 }
 0x43b   :  { %v1648_v8 = vpop.f32.mrb[20].mxu0 }
 0x43c   :  { %v1275_v24 = vadd.f32 %v1648_v8, %v1369_v27  ;;  %v1215_v31 = vpop.f32.mrb[21].mxu0 }
 0x43d   :  { %v1273_v23 = vadd.f32 %v1369_v27, %v1215_v31  ;;  %v1649_v32 = vpop.f32.mrb[22].mxu0 }
 0x43e   :  { %1291 = vst [vmem:[#allocation11 + $0x30] sm:$0xff] %v1275_v24  ;;  %v1276_v18 = vadd.f32 %v1649_v32, %v1369_v27  ;;  %v1218_v22 = vpop.f32.mrb[23].mxu0 }
 0x43f   :  { %1289 = vst [vmem:[#allocation11 + $0x20] sm:$0xff] %v1273_v23  ;;  %v1274_v26 = vadd.f32 %v1369_v27, %v1218_v22 }
 0x440   :  { %1292 = vst [vmem:[#allocation11 + $0x38] sm:$0xff] %v1276_v18 }
 0x441   :  { %1290 = vst [vmem:[#allocation11 + $0x28] sm:$0xff] %v1274_v26 }
 0x443   :  { %v1652_v30 = vpop.f32.mrb[24].mxu0 }
 0x444   :  { %v1279_v34 = vadd.f32 %v1652_v30, %v1369_v27  ;;  %v1231_v37 = vpop.f32.mrb[25].mxu0 }
 0x445   :  { %v1277_v35 = vadd.f32 %v1369_v27, %v1231_v37  ;;  %v1653_v36 = vpop.f32.mrb[26].mxu0 }
 0x446   :  { %1295 = vst [vmem:[#allocation11 + $0x50] sm:$0xff] %v1279_v34  ;;  %v1280_v39 = vadd.f32 %v1653_v36, %v1369_v27  ;;  %v1234_v48 = vpop.f32.mrb[27].mxu0 }
 0x447   :  { %1293 = vst [vmem:[#allocation11 + $0x40] sm:$0xff] %v1277_v35  ;;  %v1278_v38 = vadd.f32 %v1369_v27, %v1234_v48 }
 0x448   :  { %1296 = vst [vmem:[#allocation11 + $0x58] sm:$0xff] %v1280_v39 }
 0x449   :  { %1294 = vst [vmem:[#allocation11 + $0x48] sm:$0xff] %v1278_v38 }
 0x44b   :  { %v1656_v52 = vpop.f32.mrb[28].mxu0 }
 0x44c   :  { %v1283_v54 = vadd.f32 %v1656_v52, %v1369_v27  ;;  %v1247_v55 = vpop.f32.mrb[29].mxu0 }
 0x44d   :  { %v1281_v56 = vadd.f32 %v1369_v27, %v1247_v55  ;;  %v1657_v57 = vpop.f32.mrb[30].mxu0 }
 0x44e   :  { %1299 = vst [vmem:[#allocation11 + $0x70] sm:$0xff] %v1283_v54  ;;  %v1284_v58 = vadd.f32 %v1657_v57, %v1369_v27  ;;  %v1250_v59 = vpop.f32.mrb[31].mxu0 }
 0x44f   :  { %1297 = vst [vmem:[#allocation11 + $0x60] sm:$0xff] %v1281_v56  ;;  %v1282_v43 = vadd.f32 %v1369_v27, %v1250_v59 }
 0x450   :  { %1300 = vst [vmem:[#allocation11 + $0x78] sm:$0xff] %v1284_v58 }
 0x451   :  { %1298 = vst [vmem:[#allocation11 + $0x68] sm:$0xff] %v1282_v43 }
 0x452   :  { %1849 = shalt.err (!%p1846_p8)
}
 0x453   :  { %s1850_s30 = scalar_lea.hbm %s2297_s9, 2048 }
 0x454   :  { %p1851_p9 = scmp.ne.s32.totalorder %s2297_s9, %s1850_s30  ;;  %p1854_p10 = scmp.lt.u32.totalorder %s1850_s30, %s2297_s9 }
 0x456   :  { %p1856_p11 = pnand %p1854_p10, %p1851_p9 }
 0x458   :  { %1859 = shalt.err (!%p1856_p11)
}
 0x459   :  { %s1876_s14 = smov 128   ;;  %s1877_s6 = smov 8  }
 0x45a   :  { %1312 = dma.vmem_to_hbm [thread:$0]  %s1307_s12, 2048, %s2297_s9, [#allocation5], %s1876_s14, %s1876_s14, %s1877_s6  }
 0x45b   :  { %1866 = dma.done.wait [#allocation5], 2048  }
 0x45c   :  { %1867 = vsyncadd [#allocation5], 4294965248 }
 0x45d   :  { %1316 = vsyncpa [#allocation4], 1 }
 0x45e   :  { %1317 = vsyncpa [#allocation7], 1 }
 0x45f   :  { %1318 = vsyncpa [#allocation10], 1 }
 0x460   :  { %1319 = vsyncpa [#allocation5], 1 }

</bundles_post_ra>
